<compile_context>
chip_gen: v6e
topology: v6e:2x2x1
jax: 0.10.0
libtpu: 0.0.40
codegen_flags: <defaults>
</compile_context>

<pallas_src>
import jax
import jax.numpy as jnp
from jax.experimental import pallas as pl
from jax.experimental.pallas import tpu as pltpu

IMG_DIM = 28 * 28            # 784
NUM_CLASSES = 10
LANES = 128                  # only used for conservative VMEM accounting


def _classifier_kernel(res_ref, x_ref, wt_ref, b_ref, o_ref, h_ref):
    """One (row-block, batch-block) tile.

    res_ref : (row_tile, R)       stays resident across batch blocks
    x_ref   : (bt, R, R)
    wt_ref  : (R, 10)             W^T (no class padding)
    b_ref   : (1, 10)             bias, f32
    o_ref   : (bt, row_tile, 10)  narrow output block (no class padding)
    h_ref   : (bt, R, 10)         VMEM scratch in compute dtype
    """
    bt, r, c = h_ref.shape
    res = res_ref[...]                       # hoisted: loaded once per grid step
    bias = b_ref[...]                        # (1, 10), f32 epilogue add

    # Reassociated forward:  out[b] = res @ (x[b] @ W^T)   (fp reassoc only).
    # First matmul fused over the whole batch block -> one MXU stream.
    x_flat = x_ref[...].reshape(bt * r, r)
    h = jnp.dot(x_flat, wt_ref[...], preferred_element_type=jnp.float32)
    h_ref[...] = h.reshape(bt, r, c).astype(h_ref.dtype)   # single cast in bf16 mode

    # Second matmul per batch element; rolled loop bounds live ranges and each
    # (row_tile, 10) result is stored straight to the narrow output block.
    @pl.loop(0, bt)
    def _(b):
        o_ref[b] = jnp.dot(res, h_ref[b], preferred_element_type=jnp.float32) + bias


def _tpu_vmem_bytes() -> int:
    try:
        v = int(pltpu.get_tpu_info().vmem_capacity_bytes)
        if v > 0:
            return v
    except Exception:
        pass
    return 64 << 20            # conservative fallback (v7x per-TensorCore)


def _num_tensorcores() -> int:
    try:
        info = pltpu.get_tpu_info()
        for name in ("num_cores", "core_count", "num_tensorcores",
                     "tensorcores_per_chip"):
            v = getattr(info, name, None)
            if isinstance(v, int) and v > 0:
                return v
    except Exception:
        pass
    try:
        v = getattr(jax.devices()[0], "num_cores", None)
        if isinstance(v, int) and v > 0:
            return v
    except Exception:
        pass
    return 1


def _pick_batch_block(batch, res_dim, itemsize, vmem_cap):
    """Largest divisor of `batch` whose working set fits the VMEM budget."""
    # Generation-aware budget: ~48 MiB on 128 MiB chips (v5e/v6e), ~24 MiB on
    # 64 MiB chips (v7x). Narrow (10-class) arrays are counted at 128 lanes
    # because that is what they occupy in VMEM.
    budget = min((vmem_cap * 3) // 8, 48 << 20)
    fixed = (2 * IMG_DIM * res_dim * itemsize        # res row tile, double-buffered
             + 2 * res_dim * LANES * itemsize        # W^T
             + 2 * LANES * 4 + 4096)                 # bias + slack
    per_b = (2 * res_dim * res_dim * itemsize        # x block, double-buffered
             + 2 * IMG_DIM * LANES * 4               # out block (f32), double-buffered
             + res_dim * LANES * itemsize)           # h scratch
    avail = max(budget - fixed, per_b)
    max_bt = max(1, min(batch, avail // per_b))
    bt = 1
    for d in range(int(max_bt), 0, -1):              # divisor of B -> no jnp.pad pass
        if batch % d == 0:
            bt = d
            break
    est_bytes = fixed + bt * per_b
    return bt, est_bytes


def rand_mat_reserv_classifier(x, res, w_head, b_head, *, use_bf16=False):
    """x: (B, R, R), res: (784, R), w_head: (10, R), b_head: (10,) -> (B, 784, 10)."""
    B, R, R2 = x.shape
    assert R == R2, "x must be (B, res_dim, res_dim)"
    assert res.shape == (IMG_DIM, R)
    assert w_head.shape == (NUM_CLASSES, R) and b_head.shape == (NUM_CLASSES,)

    compute_dtype = jnp.bfloat16 if use_bf16 else jnp.float32
    itemsize = jnp.dtype(compute_dtype).itemsize

    res_c = res.astype(compute_dtype)
    x_c = x.astype(compute_dtype)
    wt_c = w_head.T.astype(compute_dtype)                    # (R, 10)
    bias = b_head.reshape(1, NUM_CLASSES).astype(jnp.float32)

    vmem_cap = _tpu_vmem_bytes()
    bt, est_bytes = _pick_batch_block(B, R, itemsize, vmem_cap)
    nb = B // bt

    # Split the 784 rows in two only when a second TensorCore would otherwise idle.
    row_blocks = 2 if (nb == 1 and _num_tensorcores() >= 2) else 1
    row_tile = IMG_DIM // row_blocks                         # 784 or 392 (both % 8 == 0)

    grid_spec = pltpu.PrefetchScalarGridSpec(
        num_scalar_prefetch=0,
        grid=(row_blocks, nb),                               # rows outer, batch inner
        in_specs=[
            # res depends only on the outer axis -> stays resident across batch blocks;
            # W^T / bias are constant -> fetched once.
            pl.BlockSpec((row_tile, R), lambda j, i: (j, 0)),        # res row tile
            pl.BlockSpec((bt, R, R), lambda j, i: (i, 0, 0)),        # x batch block
            pl.BlockSpec((R, NUM_CLASSES), lambda j, i: (0, 0)),     # W^T (narrow)
            pl.BlockSpec((1, NUM_CLASSES), lambda j, i: (0, 0)),     # bias
        ],
        out_specs=pl.BlockSpec((bt, row_tile, NUM_CLASSES), lambda j, i: (i, j, 0)),
        scratch_shapes=[pltpu.VMEM((bt, R, NUM_CLASSES), compute_dtype)],
    )

    vmem_limit = int(min(vmem_cap - (2 << 20),
                         max(est_bytes + (4 << 20), 32 << 20)))

    out = pl.pallas_call(
        _classifier_kernel,
        out_shape=jax.ShapeDtypeStruct((B, IMG_DIM, NUM_CLASSES), jnp.float32),
        grid_spec=grid_spec,
        compiler_params=pltpu.CompilerParams(
            dimension_semantics=("parallel", "parallel"),
            vmem_limit_bytes=vmem_limit,
        ),
    )(res_c, x_c, wt_c, bias)
    return out


if __name__ == "__main__":
    res_dim = 32
    batch = 2

    key = jax.random.PRNGKey(0)
    k_res, k_w, k_b, k_x = jax.random.split(key, 4)

    # Deterministic "parameters" (synthetic, mirroring __init__ shapes):
    #   res ~ randn(784, res_dim); Linear(res_dim, 10) weight/bias uniform init.
    res = jax.random.normal(k_res, (IMG_DIM, res_dim), dtype=jnp.float32)
    bound = 1.0 / float(res_dim) ** 0.5
    w_head = jax.random.uniform(k_w, (NUM_CLASSES, res_dim), jnp.float32, -bound, bound)
    b_head = jax.random.uniform(k_b, (NUM_CLASSES,), jnp.float32, -bound, bound)

    # Input (batched): x of shape (B, res_dim, res_dim)
    x = jax.random.normal(k_x, (batch, res_dim, res_dim), dtype=jnp.float32)

    out = rand_mat_reserv_classifier(x, res, w_head, b_head)
    out = jax.block_until_ready(out)

    # Pure-JAX reference (original association: head(res @ x)).
    hidden = jnp.einsum("dr,brs->bds", res, x)
    ref = jnp.einsum("bds,cs->bdc", hidden, w_head) + b_head

    assert out.shape == (batch, IMG_DIM, NUM_CLASSES)
    err = float(jnp.max(jnp.abs(out - ref)))
    assert jnp.allclose(out, ref, atol=1e-3, rtol=1e-3), err

    print("KERNEL_OK")
</pallas_src>

<mosaic_0001>
module attributes {stable_mosaic.version = 11 : i64} {
  func.func @_classifier_kernel(%arg0: i32, %arg1: i32, %arg2: memref<784x32xf32, #tpu.memory_space<vmem>>, %arg3: memref<2x32x32xf32, #tpu.memory_space<vmem>>, %arg4: memref<32x10xf32, #tpu.memory_space<vmem>>, %arg5: memref<1x10xf32, #tpu.memory_space<vmem>>, %arg6: memref<2x784x10xf32, #tpu.memory_space<vmem>>, %arg7: memref<2x32x10xf32, #tpu.memory_space<vmem>>) attributes {dimension_semantics = [#tpu.dimension_semantics<parallel>, #tpu.dimension_semantics<parallel>], iteration_bounds = array<i64: 1, 1>, scalar_prefetch = 0 : i64, scratch_operands = 1 : i64, tpu.core_type = #tpu.core_type<tc>, window_params = [{transform_indices = @transform_0, window_bounds = array<i64: 784, 32>}, {transform_indices = @transform_1, window_bounds = array<i64: 2, 32, 32>}, {pipeline_mode = #tpu.pipeline_mode<synchronous>, transform_indices = @transform_2, window_bounds = array<i64: 32, 10>}, {pipeline_mode = #tpu.pipeline_mode<synchronous>, transform_indices = @transform_3, window_bounds = array<i64: 1, 10>}, {transform_indices = @transform_4, window_bounds = array<i64: 2, 784, 10>}]} {
    %c0 = arith.constant 0 : index
    %c0_0 = arith.constant 0 : index
    %0 = vector.load %arg2[%c0, %c0_0] : memref<784x32xf32, #tpu.memory_space<vmem>>, vector<784x32xf32>
    %c0_1 = arith.constant 0 : index
    %c0_2 = arith.constant 0 : index
    %1 = vector.load %arg5[%c0_1, %c0_2] : memref<1x10xf32, #tpu.memory_space<vmem>>, vector<1x10xf32>
    %c0_3 = arith.constant 0 : index
    %c0_4 = arith.constant 0 : index
    %c0_5 = arith.constant 0 : index
    %2 = vector.load %arg3[%c0_3, %c0_4, %c0_5] : memref<2x32x32xf32, #tpu.memory_space<vmem>>, vector<2x32x32xf32>
    %3 = vector.shape_cast %2 : vector<2x32x32xf32> to vector<64x32xf32>
    %c0_6 = arith.constant 0 : index
    %c0_7 = arith.constant 0 : index
    %4 = vector.load %arg4[%c0_6, %c0_7] : memref<32x10xf32, #tpu.memory_space<vmem>>, vector<32x10xf32>
    %cst = arith.constant dense<0.000000e+00> : vector<64x10xf32>
    %5 = tpu.matmul %3, %4, %cst {dimension_numbers = #tpu.dot_dimension_numbers<[1], [0], [0], [1], [0, 0, 1, 1], [], []>} : vector<64x32xf32>, vector<32x10xf32>, vector<64x10xf32> -> vector<64x10xf32>
    %6 = vector.shape_cast %5 : vector<64x10xf32> to vector<2x32x10xf32>
    %c0_8 = arith.constant 0 : index
    %c0_9 = arith.constant 0 : index
    %c0_10 = arith.constant 0 : index
    %7 = vector.load %arg7[%c0_8, %c0_9, %c0_10] : memref<2x32x10xf32, #tpu.memory_space<vmem>>, vector<2x32x10xf32>
    tpu.vector_store %arg7[%c0_8, %c0_9, %c0_10], %6 {strides = array<i32>} : memref<2x32x10xf32, #tpu.memory_space<vmem>>, vector<2x32x10xf32>,
    %c0_i32 = arith.constant 0 : i32
    %c2_i32 = arith.constant 2 : i32
    %8 = arith.addi %c0_i32, %c2_i32 : i32
    %c1_i32 = arith.constant 1 : i32
    scf.for %arg8 = %c0_i32 to %8 step %c1_i32  : i32 {
      %c1_i32_12 = arith.constant 1 : i32
      %9 = arith.muli %arg8, %c1_i32_12 : i32
      %c0_i32_13 = arith.constant 0 : i32
      %10 = arith.addi %c0_i32_13, %9 : i32
      %11 = arith.index_cast %10 : i32 to index
      %c0_14 = arith.constant 0 : index
      %c0_15 = arith.constant 0 : index
      %12 = vector.load %arg7[%11, %c0_14, %c0_15] : memref<2x32x10xf32, #tpu.memory_space<vmem>>, vector<1x32x10xf32>
      %13 = vector.shape_cast %12 : vector<1x32x10xf32> to vector<32x10xf32>
      %cst_16 = arith.constant dense<0.000000e+00> : vector<784x10xf32>
      %14 = tpu.matmul %0, %13, %cst_16 {dimension_numbers = #tpu.dot_dimension_numbers<[1], [0], [0], [1], [0, 0, 1, 1], [], []>} : vector<784x32xf32>, vector<32x10xf32>, vector<784x10xf32> -> vector<784x10xf32>
      %15 = vector.broadcast %1 : vector<1x10xf32> to vector<784x10xf32>
      %16 = arith.addf %14, %15 : vector<784x10xf32>
      %17 = arith.index_cast %10 : i32 to index
      %c0_17 = arith.constant 0 : index
      %c0_18 = arith.constant 0 : index
      %18 = vector.load %arg6[%17, %c0_17, %c0_18] : memref<2x784x10xf32, #tpu.memory_space<vmem>>, vector<1x784x10xf32>
      %19 = vector.shape_cast %18 : vector<1x784x10xf32> to vector<784x10xf32>
      %20 = vector.shape_cast %16 : vector<784x10xf32> to vector<1x784x10xf32>
      tpu.vector_store %arg6[%17, %c0_17, %c0_18], %20 {strides = array<i32>} : memref<2x784x10xf32, #tpu.memory_space<vmem>>, vector<1x784x10xf32>,
    }
    %c2_i32_11 = arith.constant 2 : i32
    return
  }
  func.func @transform_0(%arg0: i32, %arg1: i32) -> (i32, i32) {
    %c0_i32 = arith.constant 0 : i32
    %c0_i32_0 = arith.constant 0 : i32
    return %arg0, %c0_i32 : i32, i32
  }
  func.func @transform_1(%arg0: i32, %arg1: i32) -> (i32, i32, i32) {
    %c0_i32 = arith.constant 0 : i32
    %c0_i32_0 = arith.constant 0 : i32
    %c0_i32_1 = arith.constant 0 : i32
    return %arg1, %c0_i32, %c0_i32_0 : i32, i32, i32
  }
  func.func @transform_2(%arg0: i32, %arg1: i32) -> (i32, i32) {
    %c0_i32 = arith.constant 0 : i32
    %c0_i32_0 = arith.constant 0 : i32
    %c0_i32_1 = arith.constant 0 : i32
    return %c0_i32, %c0_i32_0 : i32, i32
  }
  func.func @transform_3(%arg0: i32, %arg1: i32) -> (i32, i32) {
    %c0_i32 = arith.constant 0 : i32
    %c0_i32_0 = arith.constant 0 : i32
    %c0_i32_1 = arith.constant 0 : i32
    return %c0_i32, %c0_i32_0 : i32, i32
  }
  func.func @transform_4(%arg0: i32, %arg1: i32) -> (i32, i32, i32) {
    %c0_i32 = arith.constant 0 : i32
    %c0_i32_0 = arith.constant 0 : i32
    return %arg1, %arg0, %c0_i32 : i32, i32, i32
  }
}

</mosaic_0001>

<bundles_post_ra>
// kernel: tpu_custom_call.1
= control target key start
LH: loop header
LB: loop body
LE: loop exit
PB: predicated region body
PF: predicated region fallthrough
CT: control target
= control target key end

     0   :  { %vm128_vm0 = vcmask 261120   ;;  %vm258_vm1 = vcmask 80896   ;;  %s2753_s0 = inlined_call_operand.vmem [shape: f32[784,32], index: 0, kind: input, shape index: {}]   ;;  %s2754_s4 = inlined_call_operand.vmem [shape: f32[2,784,10], index: 4, kind: output, shape index: {}]   ;;  %s2755_s3 = inlined_call_operand.vmem [shape: f32[1,10], index: 3, kind: input, shape index: {}]   ;;  %s2756_s2 = inlined_call_operand.vmem [shape: f32[32,10], index: 2, kind: input, shape index: {}]   ;;  %s2757_s1 = inlined_call_operand.vmem [shape: f32[2,32,32], index: 1, kind: input, shape index: {}]  }
   0x1   :  { %v1704_v0 = vld [vmem:[%s2753_s0] sm:$0xff]  ;;  %v1709_v1 = vld [vmem:[%s2753_s0 + $0x8] sm:$0xff]  ;;  %v1714_v2 = vld [vmem:[%s2753_s0 + $0x10] sm:$0xff] }
   0x2   :  { %2759 = vst [vmem:[#allocation3_spill] sm:$0xff] %v1704_v0  ;;  %2760 = vst [vmem:[#allocation4_spill] sm:$0xff] %v1709_v1  ;;  %v1719_v3 = vld [vmem:[%s2753_s0 + $0x18] sm:$0xff]  ;;  %v1724_v4 = vld [vmem:[%s2753_s0 + $0x20] sm:$0xff] }
   0x3   :  { %2761 = vst [vmem:[#allocation5_spill] sm:$0xff] %v1714_v2  ;;  %2762 = vst [vmem:[#allocation6_spill] sm:$0xff] %v1719_v3  ;;  %v1729_v5 = vld [vmem:[%s2753_s0 + $0x28] sm:$0xff]  ;;  %v1734_v6 = vld [vmem:[%s2753_s0 + $0x30] sm:$0xff] }
   0x4   :  { %v1739_v7 = vld [vmem:[%s2753_s0 + $0x38] sm:$0xff]  ;;  %v1744_v8 = vld [vmem:[%s2753_s0 + $0x40] sm:$0xff]  ;;  %v1749_v9 = vld [vmem:[%s2753_s0 + $0x48] sm:$0xff] }
   0x5   :  { %v1754_v10 = vld [vmem:[%s2753_s0 + $0x50] sm:$0xff]  ;;  %v1759_v11 = vld [vmem:[%s2753_s0 + $0x58] sm:$0xff]  ;;  %v1764_v12 = vld [vmem:[%s2753_s0 + $0x60] sm:$0xff] }
   0x6   :  { %v1769_v13 = vld [vmem:[%s2753_s0 + $0x68] sm:$0xff]  ;;  %v1774_v14 = vld [vmem:[%s2753_s0 + $0x70] sm:$0xff]  ;;  %v1779_v15 = vld [vmem:[%s2753_s0 + $0x78] sm:$0xff] }
   0x7   :  { %v1784_v16 = vld [vmem:[%s2753_s0 + $0x80] sm:$0xff]  ;;  %v1789_v17 = vld [vmem:[%s2753_s0 + $0x88] sm:$0xff]  ;;  %v1794_v18 = vld [vmem:[%s2753_s0 + $0x90] sm:$0xff] }
   0x8   :  { %v1799_v19 = vld [vmem:[%s2753_s0 + $0x98] sm:$0xff]  ;;  %v1804_v20 = vld [vmem:[%s2753_s0 + $0xa0] sm:$0xff]  ;;  %v1809_v21 = vld [vmem:[%s2753_s0 + $0xa8] sm:$0xff] }
   0x9   :  { %v1814_v22 = vld [vmem:[%s2753_s0 + $0xb0] sm:$0xff]  ;;  %v1819_v23 = vld [vmem:[%s2753_s0 + $0xb8] sm:$0xff]  ;;  %v1824_v24 = vld [vmem:[%s2753_s0 + $0xc0] sm:$0xff] }
   0xa   :  { %v1829_v25 = vld [vmem:[%s2753_s0 + $0xc8] sm:$0xff]  ;;  %v1834_v26 = vld [vmem:[%s2753_s0 + $0xd0] sm:$0xff]  ;;  %v1839_v27 = vld [vmem:[%s2753_s0 + $0xd8] sm:$0xff] }
   0xb   :  { %v1844_v28 = vld [vmem:[%s2753_s0 + $0xe0] sm:$0xff]  ;;  %v1849_v29 = vld [vmem:[%s2753_s0 + $0xe8] sm:$0xff]  ;;  %v1854_v30 = vld [vmem:[%s2753_s0 + $0xf0] sm:$0xff] }
   0xc   :  { %2763 = vst [vmem:[#allocation7_spill] sm:$0xff] %v1844_v28  ;;  %2764 = vst [vmem:[#allocation8_spill] sm:$0xff] %v1849_v29  ;;  %v1859_v31 = vld [vmem:[%s2753_s0 + $0xf8] sm:$0xff]  ;;  %v1864_v32 = vld [vmem:[%s2753_s0 + $0x100] sm:$0xff] }
   0xd   :  { %2765 = vst [vmem:[#allocation9_spill] sm:$0xff] %v1854_v30  ;;  %2766 = vst [vmem:[#allocation10_spill] sm:$0xff] %v1859_v31  ;;  %v1869_v33 = vld [vmem:[%s2753_s0 + $0x108] sm:$0xff]  ;;  %v1874_v34 = vld [vmem:[%s2753_s0 + $0x110] sm:$0xff] }
   0xe   :  { %2767 = vst [vmem:[#allocation11_spill] sm:$0xff] %v1864_v32  ;;  %2768 = vst [vmem:[#allocation12_spill] sm:$0xff] %v1869_v33  ;;  %v1879_v35 = vld [vmem:[%s2753_s0 + $0x118] sm:$0xff]  ;;  %v1884_v36 = vld [vmem:[%s2753_s0 + $0x120] sm:$0xff] }
   0xf   :  { %2769 = vst [vmem:[#allocation13_spill] sm:$0xff] %v1874_v34  ;;  %2770 = vst [vmem:[#allocation14_spill] sm:$0xff] %v1879_v35  ;;  %v1889_v37 = vld [vmem:[%s2753_s0 + $0x128] sm:$0xff]  ;;  %v1894_v38 = vld [vmem:[%s2753_s0 + $0x130] sm:$0xff] }
  0x10   :  { %2771 = vst [vmem:[#allocation15_spill] sm:$0xff] %v1884_v36  ;;  %2772 = vst [vmem:[#allocation16_spill] sm:$0xff] %v1889_v37  ;;  %v1899_v39 = vld [vmem:[%s2753_s0 + $0x138] sm:$0xff]  ;;  %v1904_v40 = vld [vmem:[%s2753_s0 + $0x140] sm:$0xff] }
  0x11   :  { %2773 = vst [vmem:[#allocation17_spill] sm:$0xff] %v1894_v38  ;;  %2774 = vst [vmem:[#allocation18_spill] sm:$0xff] %v1899_v39  ;;  %v1909_v41 = vld [vmem:[%s2753_s0 + $0x148] sm:$0xff]  ;;  %v1914_v42 = vld [vmem:[%s2753_s0 + $0x150] sm:$0xff] }
  0x12   :  { %2775 = vst [vmem:[#allocation19_spill] sm:$0xff] %v1904_v40  ;;  %2776 = vst [vmem:[#allocation20_spill] sm:$0xff] %v1909_v41  ;;  %v1919_v43 = vld [vmem:[%s2753_s0 + $0x158] sm:$0xff]  ;;  %v1924_v44 = vld [vmem:[%s2753_s0 + $0x160] sm:$0xff] }
  0x13   :  { %2777 = vst [vmem:[#allocation21_spill] sm:$0xff] %v1914_v42  ;;  %2778 = vst [vmem:[#allocation22_spill] sm:$0xff] %v1919_v43  ;;  %v1929_v45 = vld [vmem:[%s2753_s0 + $0x168] sm:$0xff]  ;;  %v1934_v46 = vld [vmem:[%s2753_s0 + $0x170] sm:$0xff] }
  0x14   :  { %2779 = vst [vmem:[#allocation23_spill] sm:$0xff] %v1924_v44  ;;  %2780 = vst [vmem:[#allocation24_spill] sm:$0xff] %v1929_v45  ;;  %v1939_v47 = vld [vmem:[%s2753_s0 + $0x178] sm:$0xff]  ;;  %v1944_v48 = vld [vmem:[%s2753_s0 + $0x180] sm:$0xff] }
  0x15   :  { %2781 = vst [vmem:[#allocation25_spill] sm:$0xff] %v1934_v46  ;;  %2782 = vst [vmem:[#allocation26_spill] sm:$0xff] %v1939_v47  ;;  %v1949_v49 = vld [vmem:[%s2753_s0 + $0x188] sm:$0xff]  ;;  %v1954_v50 = vld [vmem:[%s2753_s0 + $0x190] sm:$0xff] }
  0x16   :  { %2783 = vst [vmem:[#allocation27_spill] sm:$0xff] %v1944_v48  ;;  %2784 = vst [vmem:[#allocation28_spill] sm:$0xff] %v1949_v49  ;;  %v1959_v51 = vld [vmem:[%s2753_s0 + $0x198] sm:$0xff]  ;;  %v1964_v52 = vld [vmem:[%s2753_s0 + $0x1a0] sm:$0xff] }
  0x17   :  { %v1969_v53 = vld [vmem:[%s2753_s0 + $0x1a8] sm:$0xff]  ;;  %v1974_v54 = vld [vmem:[%s2753_s0 + $0x1b0] sm:$0xff]  ;;  %v1979_v55 = vld [vmem:[%s2753_s0 + $0x1b8] sm:$0xff] }
  0x18   :  { %v1984_v56 = vld [vmem:[%s2753_s0 + $0x1c0] sm:$0xff]  ;;  %v1989_v57 = vld [vmem:[%s2753_s0 + $0x1c8] sm:$0xff]  ;;  %v1994_v58 = vld [vmem:[%s2753_s0 + $0x1d0] sm:$0xff] }
  0x19   :  { %v1999_v59 = vld [vmem:[%s2753_s0 + $0x1d8] sm:$0xff]  ;;  %v2004_v60 = vld [vmem:[%s2753_s0 + $0x1e0] sm:$0xff]  ;;  %v2009_v61 = vld [vmem:[%s2753_s0 + $0x1e8] sm:$0xff] }
  0x1a   :  { %v2014_v62 = vld [vmem:[%s2753_s0 + $0x1f0] sm:$0xff]  ;;  %v2019_v63 = vld [vmem:[%s2753_s0 + $0x1f8] sm:$0xff]  ;;  %v2024_v49 = vld [vmem:[%s2753_s0 + $0x200] sm:$0xff] }
  0x1b   :  { %v2029_v48 = vld [vmem:[%s2753_s0 + $0x208] sm:$0xff]  ;;  %v2034_v47 = vld [vmem:[%s2753_s0 + $0x210] sm:$0xff]  ;;  %v2039_v46 = vld [vmem:[%s2753_s0 + $0x218] sm:$0xff] }
  0x1c   :  { %v2044_v45 = vld [vmem:[%s2753_s0 + $0x220] sm:$0xff]  ;;  %v2049_v44 = vld [vmem:[%s2753_s0 + $0x228] sm:$0xff]  ;;  %v2054_v43 = vld [vmem:[%s2753_s0 + $0x230] sm:$0xff] }
  0x1d   :  { %v2059_v42 = vld [vmem:[%s2753_s0 + $0x238] sm:$0xff]  ;;  %v2064_v41 = vld [vmem:[%s2753_s0 + $0x240] sm:$0xff]  ;;  %v2069_v40 = vld [vmem:[%s2753_s0 + $0x248] sm:$0xff] }
  0x1e   :  { %v2074_v39 = vld [vmem:[%s2753_s0 + $0x250] sm:$0xff]  ;;  %v2079_v38 = vld [vmem:[%s2753_s0 + $0x258] sm:$0xff]  ;;  %v2084_v37 = vld [vmem:[%s2753_s0 + $0x260] sm:$0xff] }
  0x1f   :  { %v2089_v36 = vld [vmem:[%s2753_s0 + $0x268] sm:$0xff]  ;;  %v2094_v35 = vld [vmem:[%s2753_s0 + $0x270] sm:$0xff]  ;;  %v2099_v34 = vld [vmem:[%s2753_s0 + $0x278] sm:$0xff] }
  0x20   :  { %2785 = vst [vmem:[#allocation29_spill] sm:$0xff] %v2094_v35  ;;  %2786 = vst [vmem:[#allocation30_spill] sm:$0xff] %v2099_v34  ;;  %v2104_v33 = vld [vmem:[%s2753_s0 + $0x280] sm:$0xff]  ;;  %v2109_v32 = vld [vmem:[%s2753_s0 + $0x288] sm:$0xff] }
  0x21   :  { %2787 = vst [vmem:[#allocation31_spill] sm:$0xff] %v2104_v33  ;;  %2788 = vst [vmem:[#allocation32_spill] sm:$0xff] %v2109_v32  ;;  %v2114_v31 = vld [vmem:[%s2753_s0 + $0x290] sm:$0xff]  ;;  %v2119_v30 = vld [vmem:[%s2753_s0 + $0x298] sm:$0xff] }
  0x22   :  { %2789 = vst [vmem:[#allocation33_spill] sm:$0xff] %v2114_v31  ;;  %2790 = vst [vmem:[#allocation34_spill] sm:$0xff] %v2119_v30  ;;  %v2124_v34 = vld [vmem:[%s2753_s0 + $0x2a0] sm:$0xff]  ;;  %v2129_v33 = vld [vmem:[%s2753_s0 + $0x2a8] sm:$0xff] }
  0x23   :  { %2791 = vst [vmem:[#allocation35_spill] sm:$0xff] %v2124_v34  ;;  %2792 = vst [vmem:[#allocation36_spill] sm:$0xff] %v2129_v33  ;;  %v2134_v32 = vld [vmem:[%s2753_s0 + $0x2b0] sm:$0xff]  ;;  %v2139_v31 = vld [vmem:[%s2753_s0 + $0x2b8] sm:$0xff] }
  0x24   :  { %2793 = vst [vmem:[#allocation37_spill] sm:$0xff] %v2134_v32  ;;  %2794 = vst [vmem:[#allocation38_spill] sm:$0xff] %v2139_v31  ;;  %v2144_v30 = vld [vmem:[%s2753_s0 + $0x2c0] sm:$0xff]  ;;  %v2149_v34 = vld [vmem:[%s2753_s0 + $0x2c8] sm:$0xff] }
  0x25   :  { %2795 = vst [vmem:[#allocation39_spill] sm:$0xff] %v2144_v30  ;;  %2796 = vst [vmem:[#allocation40_spill] sm:$0xff] %v2149_v34  ;;  %v2154_v33 = vld [vmem:[%s2753_s0 + $0x2d0] sm:$0xff]  ;;  %v2159_v32 = vld [vmem:[%s2753_s0 + $0x2d8] sm:$0xff] }
  0x26   :  { %2797 = vst [vmem:[#allocation41_spill] sm:$0xff] %v2154_v33  ;;  %2798 = vst [vmem:[#allocation42_spill] sm:$0xff] %v2159_v32  ;;  %v2164_v31 = vld [vmem:[%s2753_s0 + $0x2e0] sm:$0xff]  ;;  %v2169_v30 = vld [vmem:[%s2753_s0 + $0x2e8] sm:$0xff] }
  0x27   :  { %2799 = vst [vmem:[#allocation43_spill] sm:$0xff] %v2164_v31  ;;  %2800 = vst [vmem:[#allocation44_spill] sm:$0xff] %v2169_v30  ;;  %v2174_v34 = vld [vmem:[%s2753_s0 + $0x2f0] sm:$0xff]  ;;  %v2179_v33 = vld [vmem:[%s2753_s0 + $0x2f8] sm:$0xff] }
  0x28   :  { %2801 = vst [vmem:[#allocation45_spill] sm:$0xff] %v2174_v34  ;;  %2802 = vst [vmem:[#allocation46_spill] sm:$0xff] %v2179_v33  ;;  %v2184_v32 = vld [vmem:[%s2753_s0 + $0x300] sm:$0xff]  ;;  %v2189_v31 = vld [vmem:[%s2753_s0 + $0x308] sm:$0xff] }
  0x29   :  { %2803 = vst [vmem:[#allocation47_spill] sm:$0xff] %v2184_v32  ;;  %2804 = vst [vmem:[#allocation48_spill] sm:$0xff] %v2189_v31  ;;  %v2194_v30 = vld [vmem:[%s2755_s3] ss:$0 sm:$0xff]  ;;  %v127_v34 = vld [vmem:[%s2756_s2 + $0x18] sm:$0xff] }
  0x2a   :  { %2805 = vst [vmem:[#allocation49_spill] sm:$0xff] %v2194_v30  ;;  %v126_v33 = vld [vmem:[%s2756_s2 + $0x10] sm:$0xff]  ;;  %1469 = vmatprep.subr.mxu0 %v127_v34  ;;  %1644 = vmatprep.subr.mxu1 %v127_v34  ;;  %v125_v31 = vld [vmem:[%s2756_s2 + $0x8] sm:$0xff]  ;;  %v124_v30 = vld [vmem:[%s2756_s2] sm:$0xff] }
  0x2b   :  { %1470 = vmatpush3.msra.mxu0 %v127_v34  ;;  %1648 = vmatpush3.msra.mxu1 %v127_v34  ;;  %v116_v34 = vld [vmem:[%s2757_s1] sm:$0xff]  ;;  %v121_v29 = vld [vmem:[%s2757_s1 + $0x28] sm:$0xff]  ;;  %v122_v35 = vld [vmem:[%s2757_s1 + $0x30] sm:$0xff] }
  0x2c   :  { %1471 = vmatprep.subr.mxu0 %v126_v33  ;;  %1645 = vmatprep.subr.mxu1 %v126_v33  ;;  %v120_v32 = vld [vmem:[%s2757_s1 + $0x20] sm:$0xff]  ;;  %v123_v28 = vld [vmem:[%s2757_s1 + $0x38] sm:$0xff] }
  0x2d   :  { %1472 = vmatpush3.msra.mxu0 %v126_v33  ;;  %1649 = vmatpush3.msra.mxu1 %v126_v33  ;;  %v117_v33 = vld [vmem:[%s2757_s1 + $0x8] sm:$0xff] }
  0x2e   :  { %1473 = vmatprep.subr.mxu0 %v125_v31  ;;  %1646 = vmatprep.subr.mxu1 %v125_v31 }
  0x2f   :  { %1474 = vmatpush3.msra.mxu0 %v125_v31  ;;  %1650 = vmatpush3.msra.mxu1 %v125_v31  ;;  %v118_v31 = vld [vmem:[%s2757_s1 + $0x10] sm:$0xff] }
  0x30   :  { %1475 = vmatprep.subr.mxu0 %v124_v30  ;;  %1647 = vmatprep.subr.mxu1 %v124_v30 }
  0x31   :  { %1476 = vmatpush3.msra.mxu0 %v124_v30  ;;  %1651 = vmatpush3.msra.mxu1 %v124_v30  ;;  %v119_v30 = vld [vmem:[%s2757_s1 + $0x18] sm:$0xff]  ;;  %s2248_s1 = smov 0  }
  0x32   :  { %1477 = vmatprep.mubr.msk.f32.mxu0 %vm128_vm0, %v116_v34  ;;  %1483 = vmatprep.mubr.msk.f32.mxu1 %vm128_vm0, %v120_v32 }
  0x33   :  { %1478 = vmatmul.mubr.msk.f32.vlgmr.msra.gmra.mxu0 %vm128_vm0, %v117_v33  ;;  %1484 = vmatmul.mubr.msk.f32.vlgmr.msra.gmra.mxu1 %vm128_vm0, %v121_v29 }
  0x34   :  { %1480 = vmatprep.mubr.msk.f32.mxu0 %vm128_vm0, %v118_v31  ;;  %1486 = vmatprep.mubr.msk.f32.mxu1 %vm128_vm0, %v122_v35 }
  0x37   :  { %1481 = vmatmul.mubr.msk.f32.gmra.mxu0 %vm128_vm0, %v119_v30  ;;  %1487 = vmatmul.mubr.msk.f32.gmra.mxu1 %vm128_vm0, %v123_v28 }
  0xf3   :  { %v1479_v32 = vpop.f32.mrf.mxu0  ;;  %v1485_v34 = vpop.f32.mrf.mxu1 }
  0xf4   :  { %260 = vst.msk [vmem:[#allocation2 + $0x8] sm:$0xff] %vm258_vm1, %v1479_v32  ;;  %264 = vst.msk [vmem:[#allocation2 + $0x28] sm:$0xff] %vm258_vm1, %v1485_v34 }
  0xf5   :  { %v219_v29 = vpop.f32.mrf.mxu0  ;;  %v239_v35 = vpop.f32.mrf.mxu1 }
  0xf6   :  { %259 = vst.msk [vmem:[#allocation2] sm:$0xff] %vm258_vm1, %v219_v29  ;;  %263 = vst.msk [vmem:[#allocation2 + $0x20] sm:$0xff] %vm258_vm1, %v239_v35 }
  0xf7   :  { %v1482_v33 = vpop.f32.mrf.mxu0  ;;  %v1488_v31 = vpop.f32.mrf.mxu1 }
  0xf8   :  { %262 = vst.msk [vmem:[#allocation2 + $0x18] sm:$0xff] %vm258_vm1, %v1482_v33  ;;  %266 = vst.msk [vmem:[#allocation2 + $0x38] sm:$0xff] %vm258_vm1, %v1488_v31 }
  0xf9   :  { %v229_v28 = vpop.f32.mrf.mxu0  ;;  %v249_v30 = vpop.f32.mrf.mxu1 }
  0xfa   :  { %261 = vst.msk [vmem:[#allocation2 + $0x10] sm:$0xff] %vm258_vm1, %v229_v28  ;;  %265 = vst.msk [vmem:[#allocation2 + $0x30] sm:$0xff] %vm258_vm1, %v249_v30 }
  0xfb LB: > { %v2806_v0 = vld [vmem:[#allocation3_spill] sm:$0xff]  ;;  %1572 = vmatprep.mubr.msk.f32.mxu1 %vm128_vm0, %v1954_v50  ;;  %s1255_s26 = sshll.u32 %s1674_s1, 5  ;;  %v2807_v1 = vld [vmem:[#allocation4_spill] sm:$0xff]  ;;  %v2808_v2 = vld [vmem:[#allocation5_spill] sm:$0xff]  ;;  %s1134_s28 = smul.u32 784, %s1674_s1  ;;  %s1674_s1 = sphi %s2248_s1, %s272_s1  }
  0xfc   : > { %1497 = vmatprep.mubr.msk.f32.mxu0 %vm128_vm0, %v2806_v0  ;;  %s274_s27 = scalar_lea.vmem [#allocation2], %s1255_s26  ;;  %v2809_v3 = vld [vmem:[#allocation6_spill] sm:$0xff]  ;;  %v2810_v33 = vld [vmem:[#allocation7_spill] sm:$0xff]  ;;  %v2811_v31 = vld [vmem:[#allocation29_spill] sm:$0xff]  ;;  %s272_s1 = sadd.s32 1, %s1674_s1  }
  0xfd   : > { %v2812_v28 = vld [vmem:[#allocation8_spill] sm:$0xff]  ;;  %v2813_v30 = vld [vmem:[#allocation30_spill] sm:$0xff]  ;;  %s2454_s5 = scalar_lea.vmem %s2754_s4, %s1134_s28  ;;  %p269_p0 = scmp.ge.s32.totalorder %s272_s1, 2  }
 0x101   : > { %v278_v32 = vld [vmem:[%s274_s27 + $0x18] sm:$0xff]  ;;  %v277_v34 = vld [vmem:[%s274_s27 + $0x10] sm:$0xff]  ;;  %v276_v29 = vld [vmem:[%s274_s27 + $0x8] sm:$0xff] }
 0x102   : > { %1489 = vmatprep.subr.mxu0 %v278_v32  ;;  %1652 = vmatprep.subr.mxu1 %v278_v32  ;;  %v275_v35 = vld [vmem:[%s274_s27] sm:$0xff] }
 0x103   : > { %1490 = vmatpush3.msra.mxu0 %v278_v32  ;;  %1656 = vmatpush3.msra.mxu1 %v278_v32  ;;  %v2814_v32 = vld [vmem:[#allocation9_spill] sm:$0xff] }
 0x104   : > { %1491 = vmatprep.subr.mxu0 %v277_v34  ;;  %1653 = vmatprep.subr.mxu1 %v277_v34 }
 0x105   : > { %1492 = vmatpush3.msra.mxu0 %v277_v34  ;;  %1657 = vmatpush3.msra.mxu1 %v277_v34  ;;  %v2815_v34 = vld [vmem:[#allocation31_spill] sm:$0xff] }
 0x106   : > { %1493 = vmatprep.subr.mxu0 %v276_v29  ;;  %1654 = vmatprep.subr.mxu1 %v276_v29 }
 0x107   : > { %1494 = vmatpush3.msra.mxu0 %v276_v29  ;;  %1658 = vmatpush3.msra.mxu1 %v276_v29  ;;  %v2816_v29 = vld [vmem:[#allocation10_spill] sm:$0xff] }
 0x108   : > { %1495 = vmatprep.subr.mxu0 %v275_v35  ;;  %1655 = vmatprep.subr.mxu1 %v275_v35 }
 0x109   : > { %1496 = vmatpush3.msra.mxu0 %v275_v35  ;;  %1659 = vmatpush3.msra.mxu1 %v275_v35  ;;  %v2817_v35 = vld [vmem:[#allocation32_spill] sm:$0xff] }
 0x10a   : > { %1498 = vmatmul.mubr.msk.f32.vlgmr.msra.gmra.mxu0 %vm128_vm0, %v2807_v1  ;;  %1573 = vmatmul.mubr.msk.f32.vlgmr.msra.gmra.mxu1 %vm128_vm0, %v1959_v51 }
 0x10b   : > { %1500 = vmatprep.mubr.msk.f32.mxu0 %vm128_vm0, %v2808_v2  ;;  %1575 = vmatprep.mubr.msk.f32.mxu1 %vm128_vm0, %v1964_v52 }
 0x10e   : > { %1501 = vmatmul.mubr.msk.f32.gmra.mxu0 %vm128_vm0, %v2809_v3  ;;  %1576 = vmatmul.mubr.msk.f32.gmra.mxu1 %vm128_vm0, %v1969_v53 }
 0x10f   : > { %1503 = vmatprep.mubr.msk.f32.mxu0 %vm128_vm0, %v1724_v4  ;;  %1578 = vmatprep.mubr.msk.f32.mxu1 %vm128_vm0, %v1974_v54 }
 0x112   : > { %1504 = vmatmul.mubr.msk.f32.gmra.mxu0 %vm128_vm0, %v1729_v5  ;;  %1579 = vmatmul.mubr.msk.f32.gmra.mxu1 %vm128_vm0, %v1979_v55 }
 0x113   : > { %1506 = vmatprep.mubr.msk.f32.mxu0 %vm128_vm0, %v1734_v6  ;;  %1581 = vmatprep.mubr.msk.f32.mxu1 %vm128_vm0, %v1984_v56 }
 0x116   : > { %1507 = vmatmul.mubr.msk.f32.gmra.mxu0 %vm128_vm0, %v1739_v7  ;;  %1582 = vmatmul.mubr.msk.f32.gmra.mxu1 %vm128_vm0, %v1989_v57 }
 0x117   : > { %1509 = vmatprep.mubr.msk.f32.mxu0 %vm128_vm0, %v1744_v8  ;;  %1584 = vmatprep.mubr.msk.f32.mxu1 %vm128_vm0, %v1994_v58 }
 0x11a   : > { %1510 = vmatmul.mubr.msk.f32.gmra.mxu0 %vm128_vm0, %v1749_v9  ;;  %1585 = vmatmul.mubr.msk.f32.gmra.mxu1 %vm128_vm0, %v1999_v59 }
 0x11b   : > { %1512 = vmatprep.mubr.msk.f32.mxu0 %vm128_vm0, %v1754_v10  ;;  %1587 = vmatprep.mubr.msk.f32.mxu1 %vm128_vm0, %v2004_v60 }
 0x11e   : > { %1513 = vmatmul.mubr.msk.f32.gmra.mxu0 %vm128_vm0, %v1759_v11  ;;  %1588 = vmatmul.mubr.msk.f32.gmra.mxu1 %vm128_vm0, %v2009_v61 }
 0x11f   : > { %1515 = vmatprep.mubr.msk.f32.mxu0 %vm128_vm0, %v1764_v12  ;;  %1590 = vmatprep.mubr.msk.f32.mxu1 %vm128_vm0, %v2014_v62 }
 0x122   : > { %1516 = vmatmul.mubr.msk.f32.gmra.mxu0 %vm128_vm0, %v1769_v13  ;;  %1591 = vmatmul.mubr.msk.f32.gmra.mxu1 %vm128_vm0, %v2019_v63 }
 0x123   : > { %1518 = vmatprep.mubr.msk.f32.mxu0 %vm128_vm0, %v1774_v14  ;;  %1593 = vmatprep.mubr.msk.f32.mxu1 %vm128_vm0, %v2024_v49 }
 0x126   : > { %1519 = vmatmul.mubr.msk.f32.gmra.mxu0 %vm128_vm0, %v1779_v15  ;;  %1594 = vmatmul.mubr.msk.f32.gmra.mxu1 %vm128_vm0, %v2029_v48 }
 0x127   : > { %1521 = vmatprep.mubr.msk.f32.mxu0 %vm128_vm0, %v1784_v16  ;;  %1596 = vmatprep.mubr.msk.f32.mxu1 %vm128_vm0, %v2034_v47 }
 0x12a   : > { %1522 = vmatmul.mubr.msk.f32.gmra.mxu0 %vm128_vm0, %v1789_v17  ;;  %1597 = vmatmul.mubr.msk.f32.gmra.mxu1 %vm128_vm0, %v2039_v46 }
 0x12b   : > { %1524 = vmatprep.mubr.msk.f32.mxu0 %vm128_vm0, %v1794_v18  ;;  %1599 = vmatprep.mubr.msk.f32.mxu1 %vm128_vm0, %v2044_v45 }
 0x12e   : > { %1525 = vmatmul.mubr.msk.f32.gmra.mxu0 %vm128_vm0, %v1799_v19  ;;  %1600 = vmatmul.mubr.msk.f32.gmra.mxu1 %vm128_vm0, %v2049_v44 }
 0x12f   : > { %1527 = vmatprep.mubr.msk.f32.mxu0 %vm128_vm0, %v1804_v20  ;;  %1602 = vmatprep.mubr.msk.f32.mxu1 %vm128_vm0, %v2054_v43 }
 0x132   : > { %1528 = vmatmul.mubr.msk.f32.gmra.mxu0 %vm128_vm0, %v1809_v21  ;;  %1603 = vmatmul.mubr.msk.f32.gmra.mxu1 %vm128_vm0, %v2059_v42 }
 0x133   : > { %1530 = vmatprep.mubr.msk.f32.mxu0 %vm128_vm0, %v1814_v22  ;;  %1605 = vmatprep.mubr.msk.f32.mxu1 %vm128_vm0, %v2064_v41 }
 0x136   : > { %1531 = vmatmul.mubr.msk.f32.gmra.mxu0 %vm128_vm0, %v1819_v23  ;;  %1606 = vmatmul.mubr.msk.f32.gmra.mxu1 %vm128_vm0, %v2069_v40 }
 0x137   : > { %1533 = vmatprep.mubr.msk.f32.mxu0 %vm128_vm0, %v1824_v24  ;;  %1608 = vmatprep.mubr.msk.f32.mxu1 %vm128_vm0, %v2074_v39 }
 0x13a   : > { %1534 = vmatmul.mubr.msk.f32.gmra.mxu0 %vm128_vm0, %v1829_v25  ;;  %1609 = vmatmul.mubr.msk.f32.gmra.mxu1 %vm128_vm0, %v2079_v38 }
 0x13b   : > { %1536 = vmatprep.mubr.msk.f32.mxu0 %vm128_vm0, %v1834_v26  ;;  %1611 = vmatprep.mubr.msk.f32.mxu1 %vm128_vm0, %v2084_v37 }
 0x13e   : > { %1537 = vmatmul.mubr.msk.f32.gmra.mxu0 %vm128_vm0, %v1839_v27  ;;  %1612 = vmatmul.mubr.msk.f32.gmra.mxu1 %vm128_vm0, %v2089_v36 }
 0x13f   : > { %1539 = vmatprep.mubr.msk.f32.mxu0 %vm128_vm0, %v2810_v33  ;;  %1614 = vmatprep.mubr.msk.f32.mxu1 %vm128_vm0, %v2811_v31  ;;  %v2818_v33 = vld [vmem:[#allocation11_spill] sm:$0xff]  ;;  %v2819_v31 = vld [vmem:[#allocation33_spill] sm:$0xff] }
 0x142   : > { %1540 = vmatmul.mubr.msk.f32.gmra.mxu0 %vm128_vm0, %v2812_v28  ;;  %1615 = vmatmul.mubr.msk.f32.gmra.mxu1 %vm128_vm0, %v2813_v30  ;;  %v2820_v28 = vld [vmem:[#allocation12_spill] sm:$0xff]  ;;  %v2821_v30 = vld [vmem:[#allocation34_spill] sm:$0xff] }
 0x143   : > { %1542 = vmatprep.mubr.msk.f32.mxu0 %vm128_vm0, %v2814_v32  ;;  %1617 = vmatprep.mubr.msk.f32.mxu1 %vm128_vm0, %v2815_v34  ;;  %v2822_v32 = vld [vmem:[#allocation13_spill] sm:$0xff]  ;;  %v2823_v34 = vld [vmem:[#allocation35_spill] sm:$0xff] }
 0x146   : > { %1543 = vmatmul.mubr.msk.f32.gmra.mxu0 %vm128_vm0, %v2816_v29  ;;  %1618 = vmatmul.mubr.msk.f32.gmra.mxu1 %vm128_vm0, %v2817_v35  ;;  %v2824_v29 = vld [vmem:[#allocation14_spill] sm:$0xff]  ;;  %v2825_v35 = vld [vmem:[#allocation36_spill] sm:$0xff] }
 0x147   : > { %1545 = vmatprep.mubr.msk.f32.mxu0 %vm128_vm0, %v2818_v33  ;;  %1620 = vmatprep.mubr.msk.f32.mxu1 %vm128_vm0, %v2819_v31  ;;  %v2826_v33 = vld [vmem:[#allocation15_spill] sm:$0xff]  ;;  %v2827_v31 = vld [vmem:[#allocation37_spill] sm:$0xff] }
 0x14a   : > { %1546 = vmatmul.mubr.msk.f32.gmra.mxu0 %vm128_vm0, %v2820_v28  ;;  %1621 = vmatmul.mubr.msk.f32.gmra.mxu1 %vm128_vm0, %v2821_v30  ;;  %v2828_v28 = vld [vmem:[#allocation16_spill] sm:$0xff]  ;;  %v2829_v30 = vld [vmem:[#allocation38_spill] sm:$0xff] }
 0x14b   : > { %1548 = vmatprep.mubr.msk.f32.mxu0 %vm128_vm0, %v2822_v32  ;;  %1623 = vmatprep.mubr.msk.f32.mxu1 %vm128_vm0, %v2823_v34  ;;  %v2830_v32 = vld [vmem:[#allocation17_spill] sm:$0xff]  ;;  %v2831_v34 = vld [vmem:[#allocation39_spill] sm:$0xff] }
 0x14e   : > { %1549 = vmatmul.mubr.msk.f32.gmra.mxu0 %vm128_vm0, %v2824_v29  ;;  %1624 = vmatmul.mubr.msk.f32.gmra.mxu1 %vm128_vm0, %v2825_v35  ;;  %v2832_v29 = vld [vmem:[#allocation18_spill] sm:$0xff]  ;;  %v2833_v35 = vld [vmem:[#allocation40_spill] sm:$0xff] }
 0x14f   : > { %1551 = vmatprep.mubr.msk.f32.mxu0 %vm128_vm0, %v2826_v33  ;;  %1626 = vmatprep.mubr.msk.f32.mxu1 %vm128_vm0, %v2827_v31  ;;  %v2834_v33 = vld [vmem:[#allocation19_spill] sm:$0xff]  ;;  %v2835_v31 = vld [vmem:[#allocation41_spill] sm:$0xff] }
 0x152   : > { %1552 = vmatmul.mubr.msk.f32.gmra.mxu0 %vm128_vm0, %v2828_v28  ;;  %1627 = vmatmul.mubr.msk.f32.gmra.mxu1 %vm128_vm0, %v2829_v30  ;;  %v2836_v28 = vld [vmem:[#allocation20_spill] sm:$0xff]  ;;  %v2837_v30 = vld [vmem:[#allocation42_spill] sm:$0xff] }
 0x153   : > { %1554 = vmatprep.mubr.msk.f32.mxu0 %vm128_vm0, %v2830_v32  ;;  %1629 = vmatprep.mubr.msk.f32.mxu1 %vm128_vm0, %v2831_v34  ;;  %v2838_v32 = vld [vmem:[#allocation21_spill] sm:$0xff]  ;;  %v2839_v34 = vld [vmem:[#allocation43_spill] sm:$0xff] }
 0x156   : > { %1555 = vmatmul.mubr.msk.f32.gmra.mxu0 %vm128_vm0, %v2832_v29  ;;  %1630 = vmatmul.mubr.msk.f32.gmra.mxu1 %vm128_vm0, %v2833_v35  ;;  %v2840_v29 = vld [vmem:[#allocation22_spill] sm:$0xff]  ;;  %v2841_v35 = vld [vmem:[#allocation44_spill] sm:$0xff] }
 0x157   : > { %1557 = vmatprep.mubr.msk.f32.mxu0 %vm128_vm0, %v2834_v33  ;;  %1632 = vmatprep.mubr.msk.f32.mxu1 %vm128_vm0, %v2835_v31  ;;  %v2842_v33 = vld [vmem:[#allocation23_spill] sm:$0xff]  ;;  %v2843_v31 = vld [vmem:[#allocation45_spill] sm:$0xff] }
 0x15a   : > { %1558 = vmatmul.mubr.msk.f32.gmra.mxu0 %vm128_vm0, %v2836_v28  ;;  %1633 = vmatmul.mubr.msk.f32.gmra.mxu1 %vm128_vm0, %v2837_v30  ;;  %v2844_v28 = vld [vmem:[#allocation24_spill] sm:$0xff]  ;;  %v2845_v30 = vld [vmem:[#allocation46_spill] sm:$0xff] }
 0x15b   : > { %1560 = vmatprep.mubr.msk.f32.mxu0 %vm128_vm0, %v2838_v32  ;;  %1635 = vmatprep.mubr.msk.f32.mxu1 %vm128_vm0, %v2839_v34  ;;  %v2846_v32 = vld [vmem:[#allocation25_spill] sm:$0xff]  ;;  %v2847_v34 = vld [vmem:[#allocation47_spill] sm:$0xff] }
 0x15e   : > { %1561 = vmatmul.mubr.msk.f32.gmra.mxu0 %vm128_vm0, %v2840_v29  ;;  %1636 = vmatmul.mubr.msk.f32.gmra.mxu1 %vm128_vm0, %v2841_v35  ;;  %v2848_v29 = vld [vmem:[#allocation26_spill] sm:$0xff]  ;;  %v2849_v35 = vld [vmem:[#allocation48_spill] sm:$0xff] }
 0x15f   : > { %1563 = vmatprep.mubr.msk.f32.mxu0 %vm128_vm0, %v2842_v33  ;;  %1638 = vmatprep.mubr.msk.f32.mxu1 %vm128_vm0, %v2843_v31  ;;  %v2850_v33 = vld [vmem:[#allocation27_spill] sm:$0xff]  ;;  %v2851_v31 = vld [vmem:[#allocation28_spill] sm:$0xff] }
 0x162   : > { %1564 = vmatmul.mubr.msk.f32.gmra.mxu0 %vm128_vm0, %v2844_v28  ;;  %1639 = vmatmul.mubr.msk.f32.gmra.mxu1 %vm128_vm0, %v2845_v30 }
 0x163   : > { %1566 = vmatprep.mubr.msk.f32.mxu0 %vm128_vm0, %v2846_v32  ;;  %1641 = vmatprep.mubr.msk.f32.mxu1 %vm128_vm0, %v2847_v34  ;;  %v2852_v32 = vld [vmem:[#allocation49_spill] sm:$0xff] }
 0x166   : > { %1567 = vmatmul.mubr.msk.f32.gmra.mxu0 %vm128_vm0, %v2848_v29  ;;  %1642 = vmatmul.mubr.msk.f32.gmra.mxu1 %vm128_vm0, %v2849_v35 }
 0x167   : > { %1569 = vmatprep.mubr.msk.f32.mxu0 %vm128_vm0, %v2850_v33 }
 0x16a   : > { %1570 = vmatmul.mubr.msk.f32.gmra.mxu0 %vm128_vm0, %v2851_v31 }
 0x1ca   : > { %v1499_v28 = vpop.f32.mrf.mxu0  ;;  %v1574_v30 = vpop.f32.mrf.mxu1 }
 0x1cb   : > { %v651_v34 = vadd.f32 %v1499_v28, %v2852_v32  ;;  %v901_v29 = vadd.f32 %v1574_v30, %v2852_v32 }
 0x1cc   : > { %v645_v35 = vpop.f32.mrf.mxu0  ;;  %v895_v33 = vpop.f32.mrf.mxu1 }
 0x1cd   : > { %1137 = vst.msk [vmem:[%s2454_s5 + $0x8] sm:$0xff] %vm258_vm1, %v651_v34  ;;  %v646_v31 = vadd.f32 %v2852_v32, %v645_v35  ;;  %1187 = vst.msk [vmem:[%s2454_s5 + $0x198] sm:$0xff] %vm258_vm1, %v901_v29  ;;  %v896_v0 = vadd.f32 %v2852_v32, %v895_v33 }
 0x1ce   : > { %v1502_v1 = vpop.f32.mrf.mxu0  ;;  %v1577_v2 = vpop.f32.mrf.mxu1 }
 0x1cf   : > { %1136 = vst.msk [vmem:[%s2454_s5] sm:$0xff] %vm258_vm1, %v646_v31  ;;  %v661_v28 = vadd.f32 %v1502_v1, %v2852_v32  ;;  %1186 = vst.msk [vmem:[%s2454_s5 + $0x190] sm:$0xff] %vm258_vm1, %v896_v0  ;;  %v911_v30 = vadd.f32 %v1577_v2, %v2852_v32 }
 0x1d0   : > { %v655_v34 = vpop.f32.mrf.mxu0  ;;  %v905_v35 = vpop.f32.mrf.mxu1 }
 0x1d1   : > { %1139 = vst.msk [vmem:[%s2454_s5 + $0x18] sm:$0xff] %vm258_vm1, %v661_v28  ;;  %v656_v29 = vadd.f32 %v2852_v32, %v655_v34  ;;  %1189 = vst.msk [vmem:[%s2454_s5 + $0x1a8] sm:$0xff] %vm258_vm1, %v911_v30  ;;  %v906_v33 = vadd.f32 %v2852_v32, %v905_v35 }
 0x1d2   : > { %v1505_v31 = vpop.f32.mrf.mxu0  ;;  %v1580_v1 = vpop.f32.mrf.mxu1 }
 0x1d3   : > { %1138 = vst.msk [vmem:[%s2454_s5 + $0x10] sm:$0xff] %vm258_vm1, %v656_v29  ;;  %v671_v0 = vadd.f32 %v1505_v31, %v2852_v32  ;;  %1188 = vst.msk [vmem:[%s2454_s5 + $0x1a0] sm:$0xff] %vm258_vm1, %v906_v33  ;;  %v921_v2 = vadd.f32 %v1580_v1, %v2852_v32 }
 0x1d4   : > { %v665_v28 = vpop.f32.mrf.mxu0  ;;  %v915_v34 = vpop.f32.mrf.mxu1 }
 0x1d5   : > { %1141 = vst.msk [vmem:[%s2454_s5 + $0x28] sm:$0xff] %vm258_vm1, %v671_v0  ;;  %v666_v30 = vadd.f32 %v2852_v32, %v665_v28  ;;  %1191 = vst.msk [vmem:[%s2454_s5 + $0x1b8] sm:$0xff] %vm258_vm1, %v921_v2  ;;  %v916_v35 = vadd.f32 %v2852_v32, %v915_v34 }
 0x1d6   : > { %v1508_v29 = vpop.f32.mrf.mxu0  ;;  %v1583_v31 = vpop.f32.mrf.mxu1 }
 0x1d7   : > { %1140 = vst.msk [vmem:[%s2454_s5 + $0x20] sm:$0xff] %vm258_vm1, %v666_v30  ;;  %v681_v33 = vadd.f32 %v1508_v29, %v2852_v32  ;;  %1190 = vst.msk [vmem:[%s2454_s5 + $0x1b0] sm:$0xff] %vm258_vm1, %v916_v35  ;;  %v931_v1 = vadd.f32 %v1583_v31, %v2852_v32 }
 0x1d8   : > { %v675_v0 = vpop.f32.mrf.mxu0  ;;  %v925_v28 = vpop.f32.mrf.mxu1 }
 0x1d9   : > { %1143 = vst.msk [vmem:[%s2454_s5 + $0x38] sm:$0xff] %vm258_vm1, %v681_v33  ;;  %v676_v2 = vadd.f32 %v2852_v32, %v675_v0  ;;  %1193 = vst.msk [vmem:[%s2454_s5 + $0x1c8] sm:$0xff] %vm258_vm1, %v931_v1  ;;  %v926_v34 = vadd.f32 %v2852_v32, %v925_v28 }
 0x1da   : > { %v1511_v30 = vpop.f32.mrf.mxu0  ;;  %v1586_v29 = vpop.f32.mrf.mxu1 }
 0x1db   : > { %1142 = vst.msk [vmem:[%s2454_s5 + $0x30] sm:$0xff] %vm258_vm1, %v676_v2  ;;  %v691_v35 = vadd.f32 %v1511_v30, %v2852_v32  ;;  %1192 = vst.msk [vmem:[%s2454_s5 + $0x1c0] sm:$0xff] %vm258_vm1, %v926_v34  ;;  %v941_v31 = vadd.f32 %v1586_v29, %v2852_v32 }
 0x1dc   : > { %v685_v33 = vpop.f32.mrf.mxu0  ;;  %v935_v0 = vpop.f32.mrf.mxu1 }
 0x1dd   : > { %1145 = vst.msk [vmem:[%s2454_s5 + $0x48] sm:$0xff] %vm258_vm1, %v691_v35  ;;  %v686_v1 = vadd.f32 %v2852_v32, %v685_v33  ;;  %1195 = vst.msk [vmem:[%s2454_s5 + $0x1d8] sm:$0xff] %vm258_vm1, %v941_v31  ;;  %v936_v28 = vadd.f32 %v2852_v32, %v935_v0 }
 0x1de   : > { %v1514_v2 = vpop.f32.mrf.mxu0  ;;  %v1589_v30 = vpop.f32.mrf.mxu1 }
 0x1df   : > { %1144 = vst.msk [vmem:[%s2454_s5 + $0x40] sm:$0xff] %vm258_vm1, %v686_v1  ;;  %v701_v34 = vadd.f32 %v1514_v2, %v2852_v32  ;;  %1194 = vst.msk [vmem:[%s2454_s5 + $0x1d0] sm:$0xff] %vm258_vm1, %v936_v28  ;;  %v951_v29 = vadd.f32 %v1589_v30, %v2852_v32 }
 0x1e0   : > { %v695_v35 = vpop.f32.mrf.mxu0  ;;  %v945_v33 = vpop.f32.mrf.mxu1 }
 0x1e1   : > { %1147 = vst.msk [vmem:[%s2454_s5 + $0x58] sm:$0xff] %vm258_vm1, %v701_v34  ;;  %v696_v31 = vadd.f32 %v2852_v32, %v695_v35  ;;  %1197 = vst.msk [vmem:[%s2454_s5 + $0x1e8] sm:$0xff] %vm258_vm1, %v951_v29  ;;  %v946_v0 = vadd.f32 %v2852_v32, %v945_v33 }
 0x1e2   : > { %v1517_v1 = vpop.f32.mrf.mxu0  ;;  %v1592_v2 = vpop.f32.mrf.mxu1 }
 0x1e3   : > { %1146 = vst.msk [vmem:[%s2454_s5 + $0x50] sm:$0xff] %vm258_vm1, %v696_v31  ;;  %v711_v28 = vadd.f32 %v1517_v1, %v2852_v32  ;;  %1196 = vst.msk [vmem:[%s2454_s5 + $0x1e0] sm:$0xff] %vm258_vm1, %v946_v0  ;;  %v961_v30 = vadd.f32 %v1592_v2, %v2852_v32 }
 0x1e4   : > { %v705_v34 = vpop.f32.mrf.mxu0  ;;  %v955_v35 = vpop.f32.mrf.mxu1 }
 0x1e5   : > { %1149 = vst.msk [vmem:[%s2454_s5 + $0x68] sm:$0xff] %vm258_vm1, %v711_v28  ;;  %v706_v29 = vadd.f32 %v2852_v32, %v705_v34  ;;  %1199 = vst.msk [vmem:[%s2454_s5 + $0x1f8] sm:$0xff] %vm258_vm1, %v961_v30  ;;  %v956_v33 = vadd.f32 %v2852_v32, %v955_v35 }
 0x1e6   : > { %v1520_v31 = vpop.f32.mrf.mxu0  ;;  %v1595_v1 = vpop.f32.mrf.mxu1 }
 0x1e7   : > { %1148 = vst.msk [vmem:[%s2454_s5 + $0x60] sm:$0xff] %vm258_vm1, %v706_v29  ;;  %v721_v0 = vadd.f32 %v1520_v31, %v2852_v32  ;;  %1198 = vst.msk [vmem:[%s2454_s5 + $0x1f0] sm:$0xff] %vm258_vm1, %v956_v33  ;;  %v971_v2 = vadd.f32 %v1595_v1, %v2852_v32 }
 0x1e8   : > { %v715_v28 = vpop.f32.mrf.mxu0  ;;  %v965_v34 = vpop.f32.mrf.mxu1 }
 0x1e9   : > { %1151 = vst.msk [vmem:[%s2454_s5 + $0x78] sm:$0xff] %vm258_vm1, %v721_v0  ;;  %v716_v30 = vadd.f32 %v2852_v32, %v715_v28  ;;  %1201 = vst.msk [vmem:[%s2454_s5 + $0x208] sm:$0xff] %vm258_vm1, %v971_v2  ;;  %v966_v35 = vadd.f32 %v2852_v32, %v965_v34 }
 0x1ea   : > { %v1523_v29 = vpop.f32.mrf.mxu0  ;;  %v1598_v31 = vpop.f32.mrf.mxu1 }
 0x1eb   : > { %1150 = vst.msk [vmem:[%s2454_s5 + $0x70] sm:$0xff] %vm258_vm1, %v716_v30  ;;  %v731_v33 = vadd.f32 %v1523_v29, %v2852_v32  ;;  %1200 = vst.msk [vmem:[%s2454_s5 + $0x200] sm:$0xff] %vm258_vm1, %v966_v35  ;;  %v981_v1 = vadd.f32 %v1598_v31, %v2852_v32 }
 0x1ec   : > { %v725_v0 = vpop.f32.mrf.mxu0  ;;  %v975_v28 = vpop.f32.mrf.mxu1 }
 0x1ed   : > { %1153 = vst.msk [vmem:[%s2454_s5 + $0x88] sm:$0xff] %vm258_vm1, %v731_v33  ;;  %v726_v2 = vadd.f32 %v2852_v32, %v725_v0  ;;  %1203 = vst.msk [vmem:[%s2454_s5 + $0x218] sm:$0xff] %vm258_vm1, %v981_v1  ;;  %v976_v34 = vadd.f32 %v2852_v32, %v975_v28 }
 0x1ee   : > { %v1526_v30 = vpop.f32.mrf.mxu0  ;;  %v1601_v29 = vpop.f32.mrf.mxu1 }
 0x1ef   : > { %1152 = vst.msk [vmem:[%s2454_s5 + $0x80] sm:$0xff] %vm258_vm1, %v726_v2  ;;  %v741_v35 = vadd.f32 %v1526_v30, %v2852_v32  ;;  %1202 = vst.msk [vmem:[%s2454_s5 + $0x210] sm:$0xff] %vm258_vm1, %v976_v34  ;;  %v991_v31 = vadd.f32 %v1601_v29, %v2852_v32 }
 0x1f0   : > { %v735_v33 = vpop.f32.mrf.mxu0  ;;  %v985_v0 = vpop.f32.mrf.mxu1 }
 0x1f1   : > { %1155 = vst.msk [vmem:[%s2454_s5 + $0x98] sm:$0xff] %vm258_vm1, %v741_v35  ;;  %v736_v1 = vadd.f32 %v2852_v32, %v735_v33  ;;  %1205 = vst.msk [vmem:[%s2454_s5 + $0x228] sm:$0xff] %vm258_vm1, %v991_v31  ;;  %v986_v28 = vadd.f32 %v2852_v32, %v985_v0 }
 0x1f2   : > { %v1529_v2 = vpop.f32.mrf.mxu0  ;;  %v1604_v30 = vpop.f32.mrf.mxu1 }
 0x1f3   : > { %1154 = vst.msk [vmem:[%s2454_s5 + $0x90] sm:$0xff] %vm258_vm1, %v736_v1  ;;  %v751_v34 = vadd.f32 %v1529_v2, %v2852_v32  ;;  %1204 = vst.msk [vmem:[%s2454_s5 + $0x220] sm:$0xff] %vm258_vm1, %v986_v28  ;;  %v1001_v29 = vadd.f32 %v1604_v30, %v2852_v32 }
 0x1f4   : > { %v745_v35 = vpop.f32.mrf.mxu0  ;;  %v995_v33 = vpop.f32.mrf.mxu1 }
 0x1f5   : > { %1157 = vst.msk [vmem:[%s2454_s5 + $0xa8] sm:$0xff] %vm258_vm1, %v751_v34  ;;  %v746_v31 = vadd.f32 %v2852_v32, %v745_v35  ;;  %1207 = vst.msk [vmem:[%s2454_s5 + $0x238] sm:$0xff] %vm258_vm1, %v1001_v29  ;;  %v996_v0 = vadd.f32 %v2852_v32, %v995_v33 }
 0x1f6   : > { %v1532_v1 = vpop.f32.mrf.mxu0  ;;  %v1607_v2 = vpop.f32.mrf.mxu1 }
 0x1f7   : > { %1156 = vst.msk [vmem:[%s2454_s5 + $0xa0] sm:$0xff] %vm258_vm1, %v746_v31  ;;  %v761_v28 = vadd.f32 %v1532_v1, %v2852_v32  ;;  %1206 = vst.msk [vmem:[%s2454_s5 + $0x230] sm:$0xff] %vm258_vm1, %v996_v0  ;;  %v1011_v30 = vadd.f32 %v1607_v2, %v2852_v32 }
 0x1f8   : > { %v755_v34 = vpop.f32.mrf.mxu0  ;;  %v1005_v35 = vpop.f32.mrf.mxu1 }
 0x1f9   : > { %1159 = vst.msk [vmem:[%s2454_s5 + $0xb8] sm:$0xff] %vm258_vm1, %v761_v28  ;;  %v756_v29 = vadd.f32 %v2852_v32, %v755_v34  ;;  %1209 = vst.msk [vmem:[%s2454_s5 + $0x248] sm:$0xff] %vm258_vm1, %v1011_v30  ;;  %v1006_v33 = vadd.f32 %v2852_v32, %v1005_v35 }
 0x1fa   : > { %v1535_v31 = vpop.f32.mrf.mxu0  ;;  %v1610_v1 = vpop.f32.mrf.mxu1 }
 0x1fb   : > { %1158 = vst.msk [vmem:[%s2454_s5 + $0xb0] sm:$0xff] %vm258_vm1, %v756_v29  ;;  %v771_v0 = vadd.f32 %v1535_v31, %v2852_v32  ;;  %1208 = vst.msk [vmem:[%s2454_s5 + $0x240] sm:$0xff] %vm258_vm1, %v1006_v33  ;;  %v1021_v2 = vadd.f32 %v1610_v1, %v2852_v32 }
 0x1fc   : > { %v765_v28 = vpop.f32.mrf.mxu0  ;;  %v1015_v34 = vpop.f32.mrf.mxu1 }
 0x1fd   : > { %1161 = vst.msk [vmem:[%s2454_s5 + $0xc8] sm:$0xff] %vm258_vm1, %v771_v0  ;;  %v766_v30 = vadd.f32 %v2852_v32, %v765_v28  ;;  %1211 = vst.msk [vmem:[%s2454_s5 + $0x258] sm:$0xff] %vm258_vm1, %v1021_v2  ;;  %v1016_v35 = vadd.f32 %v2852_v32, %v1015_v34 }
 0x1fe   : > { %v1538_v29 = vpop.f32.mrf.mxu0  ;;  %v1613_v31 = vpop.f32.mrf.mxu1 }
 0x1ff   : > { %1160 = vst.msk [vmem:[%s2454_s5 + $0xc0] sm:$0xff] %vm258_vm1, %v766_v30  ;;  %v781_v33 = vadd.f32 %v1538_v29, %v2852_v32  ;;  %1210 = vst.msk [vmem:[%s2454_s5 + $0x250] sm:$0xff] %vm258_vm1, %v1016_v35  ;;  %v1031_v1 = vadd.f32 %v1613_v31, %v2852_v32 }
 0x200   : > { %v775_v0 = vpop.f32.mrf.mxu0  ;;  %v1025_v28 = vpop.f32.mrf.mxu1 }
 0x201   : > { %1163 = vst.msk [vmem:[%s2454_s5 + $0xd8] sm:$0xff] %vm258_vm1, %v781_v33  ;;  %v776_v2 = vadd.f32 %v2852_v32, %v775_v0  ;;  %1213 = vst.msk [vmem:[%s2454_s5 + $0x268] sm:$0xff] %vm258_vm1, %v1031_v1  ;;  %v1026_v34 = vadd.f32 %v2852_v32, %v1025_v28 }
 0x202   : > { %v1541_v30 = vpop.f32.mrf.mxu0  ;;  %v1616_v29 = vpop.f32.mrf.mxu1 }
 0x203   : > { %1162 = vst.msk [vmem:[%s2454_s5 + $0xd0] sm:$0xff] %vm258_vm1, %v776_v2  ;;  %v791_v35 = vadd.f32 %v1541_v30, %v2852_v32  ;;  %1212 = vst.msk [vmem:[%s2454_s5 + $0x260] sm:$0xff] %vm258_vm1, %v1026_v34  ;;  %v1041_v31 = vadd.f32 %v1616_v29, %v2852_v32 }
 0x204   : > { %v785_v33 = vpop.f32.mrf.mxu0  ;;  %v1035_v0 = vpop.f32.mrf.mxu1 }
 0x205   : > { %1165 = vst.msk [vmem:[%s2454_s5 + $0xe8] sm:$0xff] %vm258_vm1, %v791_v35  ;;  %v786_v1 = vadd.f32 %v2852_v32, %v785_v33  ;;  %1215 = vst.msk [vmem:[%s2454_s5 + $0x278] sm:$0xff] %vm258_vm1, %v1041_v31  ;;  %v1036_v28 = vadd.f32 %v2852_v32, %v1035_v0 }
 0x206   : > { %v1544_v2 = vpop.f32.mrf.mxu0  ;;  %v1619_v30 = vpop.f32.mrf.mxu1 }
 0x207   : > { %1164 = vst.msk [vmem:[%s2454_s5 + $0xe0] sm:$0xff] %vm258_vm1, %v786_v1  ;;  %v801_v34 = vadd.f32 %v1544_v2, %v2852_v32  ;;  %1214 = vst.msk [vmem:[%s2454_s5 + $0x270] sm:$0xff] %vm258_vm1, %v1036_v28  ;;  %v1051_v29 = vadd.f32 %v1619_v30, %v2852_v32 }
 0x208   : > { %v795_v35 = vpop.f32.mrf.mxu0  ;;  %v1045_v33 = vpop.f32.mrf.mxu1 }
 0x209   : > { %1167 = vst.msk [vmem:[%s2454_s5 + $0xf8] sm:$0xff] %vm258_vm1, %v801_v34  ;;  %v796_v31 = vadd.f32 %v2852_v32, %v795_v35  ;;  %1217 = vst.msk [vmem:[%s2454_s5 + $0x288] sm:$0xff] %vm258_vm1, %v1051_v29  ;;  %v1046_v0 = vadd.f32 %v2852_v32, %v1045_v33 }
 0x20a   : > { %v1547_v1 = vpop.f32.mrf.mxu0  ;;  %v1622_v2 = vpop.f32.mrf.mxu1 }
 0x20b   : > { %1166 = vst.msk [vmem:[%s2454_s5 + $0xf0] sm:$0xff] %vm258_vm1, %v796_v31  ;;  %v811_v28 = vadd.f32 %v1547_v1, %v2852_v32  ;;  %1216 = vst.msk [vmem:[%s2454_s5 + $0x280] sm:$0xff] %vm258_vm1, %v1046_v0  ;;  %v1061_v30 = vadd.f32 %v1622_v2, %v2852_v32 }
 0x20c   : > { %v805_v34 = vpop.f32.mrf.mxu0  ;;  %v1055_v35 = vpop.f32.mrf.mxu1 }
 0x20d   : > { %1169 = vst.msk [vmem:[%s2454_s5 + $0x108] sm:$0xff] %vm258_vm1, %v811_v28  ;;  %v806_v29 = vadd.f32 %v2852_v32, %v805_v34  ;;  %1219 = vst.msk [vmem:[%s2454_s5 + $0x298] sm:$0xff] %vm258_vm1, %v1061_v30  ;;  %v1056_v33 = vadd.f32 %v2852_v32, %v1055_v35 }
 0x20e   : > { %v1550_v31 = vpop.f32.mrf.mxu0  ;;  %v1625_v1 = vpop.f32.mrf.mxu1 }
 0x20f   : > { %1168 = vst.msk [vmem:[%s2454_s5 + $0x100] sm:$0xff] %vm258_vm1, %v806_v29  ;;  %v821_v0 = vadd.f32 %v1550_v31, %v2852_v32  ;;  %1218 = vst.msk [vmem:[%s2454_s5 + $0x290] sm:$0xff] %vm258_vm1, %v1056_v33  ;;  %v1071_v2 = vadd.f32 %v1625_v1, %v2852_v32 }
 0x210   : > { %v815_v28 = vpop.f32.mrf.mxu0  ;;  %v1065_v34 = vpop.f32.mrf.mxu1 }
 0x211   : > { %1171 = vst.msk [vmem:[%s2454_s5 + $0x118] sm:$0xff] %vm258_vm1, %v821_v0  ;;  %v816_v30 = vadd.f32 %v2852_v32, %v815_v28  ;;  %1221 = vst.msk [vmem:[%s2454_s5 + $0x2a8] sm:$0xff] %vm258_vm1, %v1071_v2  ;;  %v1066_v35 = vadd.f32 %v2852_v32, %v1065_v34 }
 0x212   : > { %v1553_v29 = vpop.f32.mrf.mxu0  ;;  %v1628_v31 = vpop.f32.mrf.mxu1 }
 0x213   : > { %1170 = vst.msk [vmem:[%s2454_s5 + $0x110] sm:$0xff] %vm258_vm1, %v816_v30  ;;  %v831_v33 = vadd.f32 %v1553_v29, %v2852_v32  ;;  %1220 = vst.msk [vmem:[%s2454_s5 + $0x2a0] sm:$0xff] %vm258_vm1, %v1066_v35  ;;  %v1081_v1 = vadd.f32 %v1628_v31, %v2852_v32 }
 0x214   : > { %v825_v0 = vpop.f32.mrf.mxu0  ;;  %v1075_v28 = vpop.f32.mrf.mxu1 }
 0x215   : > { %1173 = vst.msk [vmem:[%s2454_s5 + $0x128] sm:$0xff] %vm258_vm1, %v831_v33  ;;  %v826_v2 = vadd.f32 %v2852_v32, %v825_v0  ;;  %1223 = vst.msk [vmem:[%s2454_s5 + $0x2b8] sm:$0xff] %vm258_vm1, %v1081_v1  ;;  %v1076_v34 = vadd.f32 %v2852_v32, %v1075_v28 }
 0x216   : > { %v1556_v30 = vpop.f32.mrf.mxu0  ;;  %v1631_v29 = vpop.f32.mrf.mxu1 }
 0x217   : > { %1172 = vst.msk [vmem:[%s2454_s5 + $0x120] sm:$0xff] %vm258_vm1, %v826_v2  ;;  %v841_v35 = vadd.f32 %v1556_v30, %v2852_v32  ;;  %1222 = vst.msk [vmem:[%s2454_s5 + $0x2b0] sm:$0xff] %vm258_vm1, %v1076_v34  ;;  %v1091_v31 = vadd.f32 %v1631_v29, %v2852_v32 }
 0x218   : > { %v835_v33 = vpop.f32.mrf.mxu0  ;;  %v1085_v0 = vpop.f32.mrf.mxu1 }
 0x219   : > { %1175 = vst.msk [vmem:[%s2454_s5 + $0x138] sm:$0xff] %vm258_vm1, %v841_v35  ;;  %v836_v1 = vadd.f32 %v2852_v32, %v835_v33  ;;  %1225 = vst.msk [vmem:[%s2454_s5 + $0x2c8] sm:$0xff] %vm258_vm1, %v1091_v31  ;;  %v1086_v28 = vadd.f32 %v2852_v32, %v1085_v0 }
 0x21a   : > { %v1559_v2 = vpop.f32.mrf.mxu0  ;;  %v1634_v30 = vpop.f32.mrf.mxu1 }
 0x21b   : > { %1174 = vst.msk [vmem:[%s2454_s5 + $0x130] sm:$0xff] %vm258_vm1, %v836_v1  ;;  %v851_v34 = vadd.f32 %v1559_v2, %v2852_v32  ;;  %1224 = vst.msk [vmem:[%s2454_s5 + $0x2c0] sm:$0xff] %vm258_vm1, %v1086_v28  ;;  %v1101_v29 = vadd.f32 %v1634_v30, %v2852_v32 }
 0x21c   : > { %v845_v35 = vpop.f32.mrf.mxu0  ;;  %v1095_v33 = vpop.f32.mrf.mxu1 }
 0x21d   : > { %1177 = vst.msk [vmem:[%s2454_s5 + $0x148] sm:$0xff] %vm258_vm1, %v851_v34  ;;  %v846_v31 = vadd.f32 %v2852_v32, %v845_v35  ;;  %1227 = vst.msk [vmem:[%s2454_s5 + $0x2d8] sm:$0xff] %vm258_vm1, %v1101_v29  ;;  %v1096_v0 = vadd.f32 %v2852_v32, %v1095_v33 }
 0x21e   : > { %v1562_v1 = vpop.f32.mrf.mxu0  ;;  %v1637_v2 = vpop.f32.mrf.mxu1 }
 0x21f   : > { %1176 = vst.msk [vmem:[%s2454_s5 + $0x140] sm:$0xff] %vm258_vm1, %v846_v31  ;;  %v861_v28 = vadd.f32 %v1562_v1, %v2852_v32  ;;  %1226 = vst.msk [vmem:[%s2454_s5 + $0x2d0] sm:$0xff] %vm258_vm1, %v1096_v0  ;;  %v1111_v30 = vadd.f32 %v1637_v2, %v2852_v32 }
 0x220   : > { %v855_v34 = vpop.f32.mrf.mxu0  ;;  %v1105_v35 = vpop.f32.mrf.mxu1 }
 0x221   : > { %1179 = vst.msk [vmem:[%s2454_s5 + $0x158] sm:$0xff] %vm258_vm1, %v861_v28  ;;  %v856_v29 = vadd.f32 %v2852_v32, %v855_v34  ;;  %1229 = vst.msk [vmem:[%s2454_s5 + $0x2e8] sm:$0xff] %vm258_vm1, %v1111_v30  ;;  %v1106_v33 = vadd.f32 %v2852_v32, %v1105_v35 }
 0x222   : > { %v1565_v31 = vpop.f32.mrf.mxu0  ;;  %v1640_v1 = vpop.f32.mrf.mxu1 }
 0x223   : > { %1178 = vst.msk [vmem:[%s2454_s5 + $0x150] sm:$0xff] %vm258_vm1, %v856_v29  ;;  %v871_v0 = vadd.f32 %v1565_v31, %v2852_v32  ;;  %1228 = vst.msk [vmem:[%s2454_s5 + $0x2e0] sm:$0xff] %vm258_vm1, %v1106_v33  ;;  %v1121_v2 = vadd.f32 %v1640_v1, %v2852_v32 }
 0x224   : > { %v865_v28 = vpop.f32.mrf.mxu0  ;;  %v1115_v34 = vpop.f32.mrf.mxu1 }
 0x225   : > { %1181 = vst.msk [vmem:[%s2454_s5 + $0x168] sm:$0xff] %vm258_vm1, %v871_v0  ;;  %v866_v30 = vadd.f32 %v2852_v32, %v865_v28  ;;  %1231 = vst.msk [vmem:[%s2454_s5 + $0x2f8] sm:$0xff] %vm258_vm1, %v1121_v2  ;;  %v1116_v35 = vadd.f32 %v2852_v32, %v1115_v34 }
 0x226   : > { %v1568_v29 = vpop.f32.mrf.mxu0  ;;  %v1643_v31 = vpop.f32.mrf.mxu1 }
 0x227   : > { %1180 = vst.msk [vmem:[%s2454_s5 + $0x160] sm:$0xff] %vm258_vm1, %v866_v30  ;;  %v881_v33 = vadd.f32 %v1568_v29, %v2852_v32  ;;  %1230 = vst.msk [vmem:[%s2454_s5 + $0x2f0] sm:$0xff] %vm258_vm1, %v1116_v35  ;;  %v1131_v1 = vadd.f32 %v1643_v31, %v2852_v32 }
 0x228   : > { %v875_v0 = vpop.f32.mrf.mxu0  ;;  %v1125_v28 = vpop.f32.mrf.mxu1 }
 0x229   : > { %1183 = vst.msk [vmem:[%s2454_s5 + $0x178] sm:$0xff] %vm258_vm1, %v881_v33  ;;  %v876_v2 = vadd.f32 %v2852_v32, %v875_v0  ;;  %1233 = vst.msk [vmem:[%s2454_s5 + $0x308] sm:$0xff] %vm258_vm1, %v1131_v1  ;;  %v1126_v34 = vadd.f32 %v2852_v32, %v1125_v28 }
 0x22a   : > { %v1571_v3 = vpop.f32.mrf.mxu0 }
 0x22b   : > { %1182 = vst.msk [vmem:[%s2454_s5 + $0x170] sm:$0xff] %vm258_vm1, %v876_v2  ;;  %v891_v30 = vadd.f32 %v1571_v3, %v2852_v32  ;;  %1232 = vst.msk [vmem:[%s2454_s5 + $0x300] sm:$0xff] %vm258_vm1, %v1126_v34  ;;  %271 = sbr.rel (!%p269_p0) target bundleno = 251 (0xfb), region = 45 }
 0x22c   : > { %v885_v35 = vpop.f32.mrf.mxu0 }
 0x22d   : > { %1185 = vst.msk [vmem:[%s2454_s5 + $0x188] sm:$0xff] %vm258_vm1, %v891_v30  ;;  %v886_v29 = vadd.f32 %v2852_v32, %v885_v35 }
 0x22f   : > { %1184 = vst.msk [vmem:[%s2454_s5 + $0x180] sm:$0xff] %vm258_vm1, %v886_v29 }

</bundles_post_ra>
